<compile_context>
chip_gen: v6e
topology: v6e:2x2x1
jax: 0.10.0
libtpu: 0.0.40
codegen_flags: <defaults>
</compile_context>

<pallas_src>
import functools

import jax
import jax.numpy as jnp
from jax.experimental import pallas as pl
from jax.experimental.pallas import tpu as pltpu

H = 128            # hidden width fixed by the module: Linear(128, 128)
_MAX_BLOCK_ROWS = 2048  # per-step working set stays ~5 MiB, safe on all scoped-VMEM limits


def _round_up(a, m):
    return (a + m - 1) // m * m


def dqn_kernel(x_ref, w12_ref, b12_ref, w3t_ref, b3t_ref, o_ref):
    """Fused 3-layer MLP tile.

    x_ref:   (blk, 128)        input rows (any float dtype; cast in-kernel)
    w12_ref: (128, 256)        [W1 | W2] in compute dtype (VMEM-resident)
    b12_ref: (1, 256)   f32    [b1 | b2]
    w3t_ref: (A_pad, 128)      W3 transposed, rows padded to a multiple of 8
    b3t_ref: (A_pad, 1) f32    b3 transposed
    o_ref:   (A_pad, blk) f32  layer-3 output, transposed (actions x batch)
    """
    wdt = w12_ref.dtype
    x = x_ref[...].astype(wdt)        # in-kernel cast (free on VPU, no extra HBM pass)

    # Layer 1: Linear + ReLU (MXU matmul with f32 accumulation, f32 elementwise)
    h1 = jnp.dot(x, w12_ref[:, :H], preferred_element_type=jnp.float32)
    h1 = jnp.maximum(h1 + b12_ref[:, :H], 0.0)

    # Layer 2: Linear + ReLU
    h2 = jnp.dot(h1.astype(wdt), w12_ref[:, H:], preferred_element_type=jnp.float32)
    h2 = jnp.maximum(h2 + b12_ref[:, H:], 0.0)

    # Layer 3 computed transposed: contract the shared 128-feature axis of
    # w3t (A_pad, 128) and h2 (blk, 128) -> (A_pad, blk).  Batch rides the lane
    # axis, so the stored block is tiny AND lane-dense when blk % 128 == 0.
    q = jax.lax.dot_general(
        w3t_ref[...], h2.astype(wdt),
        dimension_numbers=(((1,), (1,)), ((), ())),
        preferred_element_type=jnp.float32)
    o_ref[...] = (q + b3t_ref[...]).astype(o_ref.dtype)


def _pick_batch_tiling(B, num_batch_tiles):
    """Static choice of (padded batch, batch block).

    Default: pad to a multiple of 16 only and run the whole batch in one grid
    step (best on v5e/v6e, single TensorCore).  With num_batch_tiles > 1 (v7x),
    tiles must be a multiple of 128 rows so the transposed output stays
    lane-dense, hence padding to tiles*128.
    """
    if num_batch_tiles > 1:
        Bp = _round_up(B, num_batch_tiles * 128)
        blk = Bp // num_batch_tiles
        if blk <= _MAX_BLOCK_ROWS:
            return Bp, blk
        num_tiles = num_batch_tiles * pl.cdiv(blk, _MAX_BLOCK_ROWS)
        Bp = _round_up(B, num_tiles * 128)
        return Bp, Bp // num_tiles
    Bp = _round_up(B, 16)
    if Bp <= _MAX_BLOCK_ROWS:
        return Bp, Bp                      # single grid step
    # very large batch: stream in equal 128-multiple tiles
    num_tiles = pl.cdiv(Bp, _MAX_BLOCK_ROWS)
    Bp = _round_up(B, num_tiles * 128)
    return Bp, Bp // num_tiles


@functools.partial(jax.jit, static_argnames=("n_actions", "num_batch_tiles"))
def dqn_forward(x, w12, b12, w3t, b3t, *, n_actions, num_batch_tiles=1):
    """x: (B, 128) float.  Packed params from pack_params.  Returns (B, n_actions) f32."""
    B, F = x.shape
    assert F == H, f"expected feature dim {H}, got {F}"
    A_pad = w3t.shape[0]
    assert A_pad >= n_actions

    Bp, blk = _pick_batch_tiling(B, num_batch_tiles)
    if Bp != B:
        x = jnp.pad(x, ((0, Bp - B), (0, 0)))
    tiles = Bp // blk

    out_t = pl.pallas_call(
        dqn_kernel,
        out_shape=jax.ShapeDtypeStruct((A_pad, Bp), jnp.float32),
        grid_spec=pltpu.PrefetchScalarGridSpec(
            num_scalar_prefetch=0,
            grid=(tiles,),
            in_specs=[
                # activations: one (blk, 128) tile per grid step
                pl.BlockSpec((blk, H), lambda i: (i, 0)),
                # constants: constant index_map -> fetched once, VMEM-resident
                pl.BlockSpec((H, 2 * H), lambda i: (0, 0)),
                pl.BlockSpec((1, 2 * H), lambda i: (0, 0)),
                pl.BlockSpec((A_pad, H), lambda i: (0, 0)),
                pl.BlockSpec((A_pad, 1), lambda i: (0, 0)),
            ],
            # transposed output: tiny (A_pad, blk) block, lanes = batch
            out_specs=pl.BlockSpec((A_pad, blk), lambda i: (0, i)),
        ),
        compiler_params=pltpu.CompilerParams(
            # batch tiles are independent -> v7x's two TensorCores split them
            dimension_semantics=("parallel",),
        ),
    )(x, w12, b12, w3t, b3t)

    # (A_pad, Bp) -> (B, n_actions): tiny transpose + slice in the wrapper.
    return out_t[:n_actions, :B].T


def init_params(key, n_actions):
    """nn.Linear-shaped params stored transposed as (in, out) so the kernel
    computes x @ W + b (== PyTorch's x @ W_t.T + b)."""
    k1, k2, k3, k4, k5, k6 = jax.random.split(key, 6)
    s = 1.0 / jnp.sqrt(128.0)
    w1 = jax.random.uniform(k1, (H, H), jnp.float32, -s, s)
    b1 = jax.random.uniform(k2, (1, H), jnp.float32, -s, s)
    w2 = jax.random.uniform(k3, (H, H), jnp.float32, -s, s)
    b2 = jax.random.uniform(k4, (1, H), jnp.float32, -s, s)
    w3 = jax.random.uniform(k5, (H, n_actions), jnp.float32, -s, s)
    b3 = jax.random.uniform(k6, (1, n_actions), jnp.float32, -s, s)
    return w1, b1, w2, b2, w3, b3


def pack_params(w1, b1, w2, b2, w3, b3, compute_dtype=jnp.float32):
    """Pack + pre-cast ONCE (outside the hot forward).

    w12: (128, 256) compute dtype, b12: (1, 256) f32,
    w3t: (A_pad, 128) compute dtype (W3 transposed, zero-padded rows),
    b3t: (A_pad, 1) f32.  Works for any n_actions (A_pad = round_up(n_actions, 8)).
    """
    n_actions = w3.shape[1]
    a_pad = _round_up(n_actions, 8) - n_actions
    w12 = jnp.concatenate([w1, w2], axis=1).astype(compute_dtype)           # (128, 256)
    b12 = jnp.concatenate([b1, b2], axis=1).astype(jnp.float32)             # (1, 256)
    w3t = jnp.pad(w3.T, ((0, a_pad), (0, 0))).astype(compute_dtype)         # (A_pad, 128)
    b3t = jnp.pad(b3.T, ((0, a_pad), (0, 0))).astype(jnp.float32)           # (A_pad, 1)
    return w12, b12, w3t, b3t


def reference_forward(x, w1, b1, w2, b2, w3, b3):
    h1 = jnp.maximum(x @ w1 + b1, 0.0)
    h2 = jnp.maximum(h1 @ w2 + b2, 0.0)
    return h2 @ w3 + b3


if __name__ == "__main__":
    key = jax.random.PRNGKey(0)
    kx1, kx2, kp = jax.random.split(key, 3)

    n_actions = 4
    params = init_params(kp, n_actions)
    # f32 packed params (packed / cast once, outside the jitted forward)
    w12, b12, w3t, b3t = pack_params(*params)

    # Small act()-style batch: single grid step, padded 8 -> 16 rows only.
    x_small = jax.random.normal(kx1, (8, H), jnp.float32)
    out_small = jax.block_until_ready(
        dqn_forward(x_small, w12, b12, w3t, b3t, n_actions=n_actions))
    ref_small = reference_forward(x_small, *params)
    assert out_small.shape == (8, n_actions)
    assert jnp.allclose(out_small, ref_small, atol=1e-4, rtol=1e-4), \
        "small-batch mismatch vs reference"

    # Replay-buffer batch: whole batch in ONE grid step (best on v5e/v6e).
    x_big = jax.random.normal(kx2, (256, H), jnp.float32)
    out_big = jax.block_until_ready(
        dqn_forward(x_big, w12, b12, w3t, b3t, n_actions=n_actions))
    ref_big = reference_forward(x_big, *params)
    assert out_big.shape == (256, n_actions)
    assert jnp.allclose(out_big, ref_big, atol=1e-4, rtol=1e-4), \
        "large-batch (single tile) mismatch vs reference"

    # v7x-style: exactly two 128-row tiles so both TensorCores get work.
    out_2t = jax.block_until_ready(
        dqn_forward(x_big, w12, b12, w3t, b3t, n_actions=n_actions,
                    num_batch_tiles=2))
    assert jnp.allclose(out_2t, ref_big, atol=1e-4, rtol=1e-4), \
        "two-tile mismatch vs reference"

    # bf16 fast path (v6e/v7x): weights pre-cast once to bf16; x stays f32 in
    # HBM and is cast inside the kernel; dots accumulate f32, bias/ReLU f32.
    w12b, b12b, w3tb, b3tb = pack_params(*params, compute_dtype=jnp.bfloat16)
    out_bf16 = jax.block_until_ready(
        dqn_forward(x_big, w12b, b12b, w3tb, b3tb, n_actions=n_actions))
    assert jnp.allclose(out_bf16, ref_big, atol=1e-1, rtol=1e-1), \
        "bf16 path mismatch vs reference"

    print("KERNEL_OK")
</pallas_src>

<mosaic_0001>
module attributes {stable_mosaic.version = 11 : i64} {
  func.func @dqn_kernel(%arg0: i32, %arg1: memref<16x128xf32, #tpu.memory_space<vmem>>, %arg2: memref<128x256xf32, #tpu.memory_space<vmem>>, %arg3: memref<1x256xf32, #tpu.memory_space<vmem>>, %arg4: memref<8x128xf32, #tpu.memory_space<vmem>>, %arg5: memref<8x1xf32, #tpu.memory_space<vmem>>, %arg6: memref<8x16xf32, #tpu.memory_space<vmem>>) attributes {dimension_semantics = [#tpu.dimension_semantics<parallel>], iteration_bounds = array<i64: 1>, scalar_prefetch = 0 : i64, scratch_operands = 0 : i64, tpu.core_type = #tpu.core_type<tc>, window_params = [{transform_indices = @transform_0, window_bounds = array<i64: 16, 128>}, {pipeline_mode = #tpu.pipeline_mode<synchronous>, transform_indices = @transform_1, window_bounds = array<i64: 128, 256>}, {pipeline_mode = #tpu.pipeline_mode<synchronous>, transform_indices = @transform_2, window_bounds = array<i64: 1, 256>}, {pipeline_mode = #tpu.pipeline_mode<synchronous>, transform_indices = @transform_3, window_bounds = array<i64: 8, 128>}, {pipeline_mode = #tpu.pipeline_mode<synchronous>, transform_indices = @transform_4, window_bounds = array<i64: 8, 1>}, {transform_indices = @transform_5, window_bounds = array<i64: 8, 16>}]} {
    %c0 = arith.constant 0 : index
    %c0_0 = arith.constant 0 : index
    %0 = vector.load %arg1[%c0, %c0_0] : memref<16x128xf32, #tpu.memory_space<vmem>>, vector<16x128xf32>
    %c0_1 = arith.constant 0 : index
    %c0_2 = arith.constant 0 : index
    %1 = vector.load %arg2[%c0_1, %c0_2] : memref<128x256xf32, #tpu.memory_space<vmem>>, vector<128x128xf32>
    %cst = arith.constant dense<0.000000e+00> : vector<16x128xf32>
    %2 = tpu.matmul %0, %1, %cst {dimension_numbers = #tpu.dot_dimension_numbers<[1], [0], [0], [1], [0, 0, 1, 1], [], []>} : vector<16x128xf32>, vector<128x128xf32>, vector<16x128xf32> -> vector<16x128xf32>
    %c0_3 = arith.constant 0 : index
    %c0_4 = arith.constant 0 : index
    %3 = vector.load %arg3[%c0_3, %c0_4] : memref<1x256xf32, #tpu.memory_space<vmem>>, vector<1x128xf32>
    %4 = vector.broadcast %3 : vector<1x128xf32> to vector<16x128xf32>
    %5 = arith.addf %2, %4 : vector<16x128xf32>
    %cst_5 = arith.constant 0.000000e+00 : f32
    %6 = vector.broadcast %cst_5 : f32 to vector<16x128xf32>
    %7 = arith.maximumf %5, %6 : vector<16x128xf32>
    %c0_6 = arith.constant 0 : index
    %c128 = arith.constant 128 : index
    %8 = vector.load %arg2[%c0_6, %c128] : memref<128x256xf32, #tpu.memory_space<vmem>>, vector<128x128xf32>
    %cst_7 = arith.constant dense<0.000000e+00> : vector<16x128xf32>
    %9 = tpu.matmul %7, %8, %cst_7 {dimension_numbers = #tpu.dot_dimension_numbers<[1], [0], [0], [1], [0, 0, 1, 1], [], []>} : vector<16x128xf32>, vector<128x128xf32>, vector<16x128xf32> -> vector<16x128xf32>
    %c0_8 = arith.constant 0 : index
    %c128_9 = arith.constant 128 : index
    %10 = vector.load %arg3[%c0_8, %c128_9] : memref<1x256xf32, #tpu.memory_space<vmem>>, vector<1x128xf32>
    %11 = vector.broadcast %10 : vector<1x128xf32> to vector<16x128xf32>
    %12 = arith.addf %9, %11 : vector<16x128xf32>
    %cst_10 = arith.constant 0.000000e+00 : f32
    %13 = vector.broadcast %cst_10 : f32 to vector<16x128xf32>
    %14 = arith.maximumf %12, %13 : vector<16x128xf32>
    %c0_11 = arith.constant 0 : index
    %c0_12 = arith.constant 0 : index
    %15 = vector.load %arg4[%c0_11, %c0_12] : memref<8x128xf32, #tpu.memory_space<vmem>>, vector<8x128xf32>
    %cst_13 = arith.constant dense<0.000000e+00> : vector<8x16xf32>
    %16 = tpu.matmul %15, %14, %cst_13 {dimension_numbers = #tpu.dot_dimension_numbers<[1], [1], [0], [0], [0, 0, 1, 0], [], []>} : vector<8x128xf32>, vector<16x128xf32>, vector<8x16xf32> -> vector<8x16xf32>
    %c0_14 = arith.constant 0 : index
    %c0_15 = arith.constant 0 : index
    %17 = vector.load %arg5[%c0_14, %c0_15] : memref<8x1xf32, #tpu.memory_space<vmem>>, vector<8x1xf32>
    %18 = vector.broadcast %17 : vector<8x1xf32> to vector<8x16xf32>
    %19 = arith.addf %16, %18 : vector<8x16xf32>
    %c0_16 = arith.constant 0 : index
    %c0_17 = arith.constant 0 : index
    %20 = vector.load %arg6[%c0_16, %c0_17] : memref<8x16xf32, #tpu.memory_space<vmem>>, vector<8x16xf32>
    tpu.vector_store %arg6[%c0_16, %c0_17], %19 {strides = array<i32>} : memref<8x16xf32, #tpu.memory_space<vmem>>, vector<8x16xf32>,
    return
  }
  func.func @transform_0(%arg0: i32) -> (i32, i32) {
    %c0_i32 = arith.constant 0 : i32
    %c0_i32_0 = arith.constant 0 : i32
    return %arg0, %c0_i32 : i32, i32
  }
  func.func @transform_1(%arg0: i32) -> (i32, i32) {
    %c0_i32 = arith.constant 0 : i32
    %c0_i32_0 = arith.constant 0 : i32
    %c0_i32_1 = arith.constant 0 : i32
    return %c0_i32, %c0_i32_0 : i32, i32
  }
  func.func @transform_2(%arg0: i32) -> (i32, i32) {
    %c0_i32 = arith.constant 0 : i32
    %c0_i32_0 = arith.constant 0 : i32
    %c0_i32_1 = arith.constant 0 : i32
    return %c0_i32, %c0_i32_0 : i32, i32
  }
  func.func @transform_3(%arg0: i32) -> (i32, i32) {
    %c0_i32 = arith.constant 0 : i32
    %c0_i32_0 = arith.constant 0 : i32
    %c0_i32_1 = arith.constant 0 : i32
    return %c0_i32, %c0_i32_0 : i32, i32
  }
  func.func @transform_4(%arg0: i32) -> (i32, i32) {
    %c0_i32 = arith.constant 0 : i32
    %c0_i32_0 = arith.constant 0 : i32
    %c0_i32_1 = arith.constant 0 : i32
    return %c0_i32, %c0_i32_0 : i32, i32
  }
  func.func @transform_5(%arg0: i32) -> (i32, i32) {
    %c0_i32 = arith.constant 0 : i32
    %c0_i32_0 = arith.constant 0 : i32
    return %c0_i32, %arg0 : i32, i32
  }
}

</mosaic_0001>

<bundles_post_ra>
// kernel: dqn_forward.1
= control target key start
LH: loop header
LB: loop body
LE: loop exit
PB: predicated region body
PF: predicated region fallthrough
CT: control target
= control target key end

     0   :  { %10 = vsyncpa [#allocation3], 0  ;;  %s467_s18 = smov [#allocation2]   ;;  %s527_s0 = inlined_call_operand.vmem [shape: f32[16,128], index: 0, kind: input, shape index: {}]   ;;  %s528_s1 = inlined_call_operand.hbm [shape: f32[128,256], index: 1, kind: input, shape index: {}]   ;;  %s529_s2 = inlined_call_operand.vmem [shape: f32[1,256], index: 2, kind: input, shape index: {}]   ;;  %s530_s3 = inlined_call_operand.vmem [shape: f32[8,128], index: 3, kind: input, shape index: {}]   ;;  %s531_s4 = inlined_call_operand.vmem [shape: f32[8,1], index: 4, kind: input, shape index: {}]   ;;  %s532_s5 = inlined_call_operand.vmem [shape: f32[8,16], index: 5, kind: output, shape index: {}]  }
   0x1   :  { %s18_s19 = sshll.u32 %s467_s18, 4  ;;  %s19_s19 = int_to_ptr.vmem [resolvable:$true] %s18_s19 }
   0x2   :  { %s453_s20 = scalar_lea.vmem %s19_s19, 4096  ;;  %p458_p1 = scmp.lt.s32.totalorder %s19_s19, %s19_s19 }
   0x3   :  { %p454_p0 = scmp.ne.s32.totalorder %s19_s19, %s453_s20  ;;  %p459_p2 = scmp.lt.s32.totalorder %s453_s20, %s453_s20 }
   0x5   :  { %p460_p3 = por %p459_p2, %p458_p1 }
   0x7   :  { %p461_p4 = pnand %p460_p3, %p454_p0 }
   0x9   :  { %464 = shalt.err (!%p461_p4)
}
   0xa   :  { %s468_s21 = smov 256   ;;  %s469_s22 = smov 16  }
   0xb   :  { %24 = dma.hbm_to_vmem [thread:$0]  %s528_s1, 4096, %s19_s19, [#allocation3], %s468_s21, %s468_s21, %s469_s22  }
   0xc   :  { %465 = dma.done.wait [#allocation3], 4096  }
   0xd   :  { %466 = vsyncadd [#allocation3], 4294963200  ;;  %v51_v0 = vld [vmem:[#allocation2 + $0xf0] sm:$0xff]  ;;  %v50_v1 = vld [vmem:[#allocation2 + $0xe0] sm:$0xff]  ;;  %v470_v41 = vmov 0.0   ;;  %vm471_vm0 = vmmov 0  }
   0xe   :  { %361 = vmatprep.subr.mxu0 %v51_v0  ;;  %v49_v2 = vld [vmem:[#allocation2 + $0xd0] sm:$0xff]  ;;  %v48_v3 = vld [vmem:[#allocation2 + $0xc0] sm:$0xff]  ;;  %v151_v6 = vld [vmem:[#allocation2 + $0xf8] sm:$0xff]  ;;  %v472_v43 = vmov 0   ;;  %vm313_vm1 = vcmask 130048  }
   0xf   :  { %362 = vmatpush3.msra.mxu0 %v51_v0  ;;  %v34_v4 = vld [vmem:[%s527_s0] sm:$0xff]  ;;  %v47_v5 = vld [vmem:[#allocation2 + $0xb0] sm:$0xff]  ;;  %v150_v7 = vld [vmem:[#allocation2 + $0xe8] sm:$0xff]  ;;  %396 = vmatprep.subr.mxu1 %v151_v6 }
  0x10   :  { %363 = vmatprep.subr.mxu0 %v50_v1  ;;  %393 = vmatprep.mubr.f32.mxu0 %v34_v4  ;;  %v46_v8 = vld [vmem:[#allocation2 + $0xa0] sm:$0xff]  ;;  %v149_v9 = vld [vmem:[#allocation2 + $0xd8] sm:$0xff]  ;;  %v45_v10 = vld [vmem:[#allocation2 + $0x90] sm:$0xff] }
  0x11   :  { %364 = vmatpush3.msra.mxu0 %v50_v1  ;;  %397 = vmatpush3.msra.mxu1 %v151_v6  ;;  %v148_v11 = vld [vmem:[#allocation2 + $0xc8] sm:$0xff]  ;;  %v44_v12 = vld [vmem:[#allocation2 + $0x80] sm:$0xff]  ;;  %v147_v13 = vld [vmem:[#allocation2 + $0xb8] sm:$0xff] }
  0x12   :  { %365 = vmatprep.subr.mxu0 %v49_v2  ;;  %398 = vmatprep.subr.mxu1 %v150_v7  ;;  %v43_v14 = vld [vmem:[#allocation2 + $0x70] sm:$0xff]  ;;  %v146_v15 = vld [vmem:[#allocation2 + $0xa8] sm:$0xff]  ;;  %v42_v16 = vld [vmem:[#allocation2 + $0x60] sm:$0xff] }
  0x13   :  { %366 = vmatpush3.msra.mxu0 %v49_v2  ;;  %399 = vmatpush3.msra.mxu1 %v150_v7  ;;  %v145_v17 = vld [vmem:[#allocation2 + $0x98] sm:$0xff]  ;;  %v41_v18 = vld [vmem:[#allocation2 + $0x50] sm:$0xff]  ;;  %v144_v19 = vld [vmem:[#allocation2 + $0x88] sm:$0xff] }
  0x14   :  { %367 = vmatprep.subr.mxu0 %v48_v3  ;;  %400 = vmatprep.subr.mxu1 %v149_v9  ;;  %v40_v20 = vld [vmem:[#allocation2 + $0x40] sm:$0xff]  ;;  %v143_v21 = vld [vmem:[#allocation2 + $0x78] sm:$0xff]  ;;  %v39_v22 = vld [vmem:[#allocation2 + $0x30] sm:$0xff] }
  0x15   :  { %368 = vmatpush3.msra.mxu0 %v48_v3  ;;  %401 = vmatpush3.msra.mxu1 %v149_v9  ;;  %v142_v23 = vld [vmem:[#allocation2 + $0x68] sm:$0xff]  ;;  %v38_v24 = vld [vmem:[#allocation2 + $0x20] sm:$0xff]  ;;  %v141_v25 = vld [vmem:[#allocation2 + $0x58] sm:$0xff] }
  0x16   :  { %369 = vmatprep.subr.mxu0 %v47_v5  ;;  %402 = vmatprep.subr.mxu1 %v148_v11  ;;  %v37_v26 = vld [vmem:[#allocation2 + $0x10] sm:$0xff]  ;;  %v140_v27 = vld [vmem:[#allocation2 + $0x48] sm:$0xff]  ;;  %v36_v28 = vld [vmem:[#allocation2] sm:$0xff] }
  0x17   :  { %370 = vmatpush3.msra.mxu0 %v47_v5  ;;  %403 = vmatpush3.msra.mxu1 %v148_v11  ;;  %v35_v29 = vld [vmem:[%s527_s0 + $0x8] sm:$0xff]  ;;  %v139_v30 = vld [vmem:[#allocation2 + $0x38] sm:$0xff]  ;;  %v320_v34 = vld [vmem:[%s529_s2] ss:$0 sm:$0xff] }
  0x18   :  { %371 = vmatprep.subr.mxu0 %v46_v8  ;;  %404 = vmatprep.subr.mxu1 %v147_v13  ;;  %v138_v31 = vld [vmem:[#allocation2 + $0x28] sm:$0xff]  ;;  %v137_v32 = vld [vmem:[#allocation2 + $0x18] sm:$0xff]  ;;  %v237_v42 = vld [vmem:[%s531_s4] sm:$0xff] }
  0x19   :  { %372 = vmatpush3.msra.mxu0 %v46_v8  ;;  %405 = vmatpush3.msra.mxu1 %v147_v13  ;;  %v136_v33 = vld [vmem:[#allocation2 + $0x8] sm:$0xff]  ;;  %v321_v44 = vld [vmem:[%s529_s2 + $0x1] ss:$0 sm:$0xff] }
  0x1a   :  { %373 = vmatprep.subr.mxu0 %v45_v10  ;;  %406 = vmatprep.subr.mxu1 %v146_v15  ;;  %v236_v51 = vld [vmem:[%s530_s3] sm:$0xff] }
  0x1b   :  { %374 = vmatpush3.msra.mxu0 %v45_v10  ;;  %407 = vmatpush3.msra.mxu1 %v146_v15 }
  0x1c   :  { %375 = vmatprep.subr.mxu0 %v44_v12  ;;  %408 = vmatprep.subr.mxu1 %v145_v17 }
  0x1d   :  { %376 = vmatpush3.msra.mxu0 %v44_v12  ;;  %409 = vmatpush3.msra.mxu1 %v145_v17 }
  0x1e   :  { %377 = vmatprep.subr.mxu0 %v43_v14  ;;  %410 = vmatprep.subr.mxu1 %v144_v19 }
  0x1f   :  { %378 = vmatpush3.msra.mxu0 %v43_v14  ;;  %411 = vmatpush3.msra.mxu1 %v144_v19 }
  0x20   :  { %379 = vmatprep.subr.mxu0 %v42_v16  ;;  %412 = vmatprep.subr.mxu1 %v143_v21 }
  0x21   :  { %380 = vmatpush3.msra.mxu0 %v42_v16  ;;  %413 = vmatpush3.msra.mxu1 %v143_v21 }
  0x22   :  { %381 = vmatprep.subr.mxu0 %v41_v18  ;;  %414 = vmatprep.subr.mxu1 %v142_v23 }
  0x23   :  { %382 = vmatpush3.msra.mxu0 %v41_v18  ;;  %415 = vmatpush3.msra.mxu1 %v142_v23 }
  0x24   :  { %383 = vmatprep.subr.mxu0 %v40_v20  ;;  %416 = vmatprep.subr.mxu1 %v141_v25 }
  0x25   :  { %384 = vmatpush3.msra.mxu0 %v40_v20  ;;  %417 = vmatpush3.msra.mxu1 %v141_v25 }
  0x26   :  { %385 = vmatprep.subr.mxu0 %v39_v22  ;;  %418 = vmatprep.subr.mxu1 %v140_v27 }
  0x27   :  { %386 = vmatpush3.msra.mxu0 %v39_v22  ;;  %419 = vmatpush3.msra.mxu1 %v140_v27 }
  0x28   :  { %387 = vmatprep.subr.mxu0 %v38_v24  ;;  %420 = vmatprep.subr.mxu1 %v139_v30 }
  0x29   :  { %388 = vmatpush3.msra.mxu0 %v38_v24  ;;  %421 = vmatpush3.msra.mxu1 %v139_v30 }
  0x2a   :  { %389 = vmatprep.subr.mxu0 %v37_v26  ;;  %422 = vmatprep.subr.mxu1 %v138_v31 }
  0x2b   :  { %390 = vmatpush3.msra.mxu0 %v37_v26  ;;  %423 = vmatpush3.msra.mxu1 %v138_v31 }
  0x2c   :  { %391 = vmatprep.subr.mxu0 %v36_v28  ;;  %424 = vmatprep.subr.mxu1 %v137_v32 }
  0x2d   :  { %392 = vmatpush3.msra.mxu0 %v36_v28  ;;  %425 = vmatpush3.msra.mxu1 %v137_v32 }
  0x2e   :  { %394 = vmatmul.mubr.f32.vlgmr.msra.gmra.mxu0 %v35_v29  ;;  %426 = vmatprep.subr.mxu1 %v136_v33 }
  0x2f   :  { %427 = vmatpush3.msra.mxu1 %v136_v33  ;;  %431 = vmatprep.subr.mxu0 %v470_v41 }
  0x30   :  { %435 = vmatprep.mubr.msk.f32.mxu0 %vm471_vm0, %v470_v41  ;;  %444 = vset.pattern.permute.xlu0 %v472_v43 }
  0x31   :  { %240 = vperm.xlu0 %444, %v237_v42  }
  0xac   :  { %v241_v52 = vpop.permute.xlu0 %240 }
  0xee   :  { %v395_v35 = vpop.f32.mrf.mxu0 }
  0xef   :  { %v131_v36 = vadd.f32 %v395_v35, %v320_v34 }
  0xf0   :  { %v125_v37 = vpop.f32.mrf.mxu0 }
  0xf1   :  { %v126_v38 = vadd.f32 %v320_v34, %v125_v37  ;;  %v135_v40 = vmax.f32 %v131_v36, 0.0 }
  0xf3   :  { %v134_v39 = vmax.f32 %v126_v38, 0.0 }
  0xf5   :  { %428 = vmatprep.mubr.f32.mxu1 %v134_v39 }
  0xf6   :  { %429 = vmatmul.mubr.f32.vlgmr.msra.gmra.mxu1 %v135_v40 }
 0x1b6   :  { %v430_v45 = vpop.f32.mrf.mxu1 }
 0x1b7   :  { %v231_v46 = vadd.f32 %v430_v45, %v321_v44 }
 0x1b8   :  { %v225_v47 = vpop.f32.mrf.mxu1 }
 0x1b9   :  { %v235_v48 = vmax.f32 %v231_v46, 0.0  ;;  %v226_v49 = vadd.f32 %v321_v44, %v225_v47 }
 0x1bb   :  { %432 = vmatpush3.xpose.msra.mxu0 %v235_v48  ;;  %v234_v50 = vmax.f32 %v226_v49, 0.0 }
 0x1bc   :  { %433 = vmatprep.subr.mxu0 %v470_v41 }
 0x1bf   :  { %434 = vmatpush3.xpose.msra.mxu0 %v234_v50 }
 0x1c2   :  { %436 = vmatmul.mubr.f32.vlgmr.msra.gmra.mxu0 %v236_v51 }
 0x282   :  { %v309_v53 = vpop.f32.mrf.mxu0 }
 0x283   :  { %v310_v54 = vadd.f32 %v309_v53, %v241_v52 }
 0x284   :  { %v437_v55 = vpop.f32.mrf.mxu0 }
 0x285   :  { %314 = vst.msk [vmem:[%s532_s5] sm:$0xff] %vm313_vm1, %v310_v54 }
 0x286   :  { %319 = vsyncpa [#allocation3], 1 }

</bundles_post_ra>
